<compile_context>
chip_gen: v6e
topology: v6e:2x2x1
jax: 0.10.0
libtpu: 0.0.40
codegen_flags: <defaults>
</compile_context>

<pallas_src>
import functools

import jax
import jax.numpy as jnp
from jax.experimental import pallas as pl
from jax.experimental.pallas import tpu as pltpu

_LANE = 128
_SUBLANE = 16  # covers bf16 (16) and f32 (8) sublane alignment


def _round_up(x, m):
    return (x + m - 1) // m * m


def _vmem_capacity_bytes():
    """Per-generation VMEM capacity (v5e/v6e: 128 MiB, v7x: 64 MiB/TC)."""
    try:
        return int(pltpu.get_tpu_info().vmem_capacity_bytes)
    except Exception:
        return 64 * 1024 * 1024  # conservative fallback (v7x per-TC)


def _make_mlp_kernel(num_layers: int, use_ln: bool, hidden_real: int, eps: float = 1e-5):
    """Fused kernel: num_layers x (Linear [-> LayerNorm] -> ReLU) -> Linear."""
    # NOTE: all hidden layers in DeepDenseDANN share the same width, so a single
    # inv_h is exact; would need per-layer widths if that ever changes.
    inv_h = 1.0 / float(hidden_real)

    def kernel(*refs):
        # refs = (x, w1, b1, ..., wN, bN, w_out, b_out, o_ref)
        o_ref = refs[-1]
        x = refs[0][...].astype(jnp.bfloat16)              # in-kernel cast, no HBM copy
        idx = 1
        for _ in range(num_layers):
            w = refs[idx][...]                             # bf16 (in_pad, out_pad)
            b = refs[idx + 1][...]                         # f32  (1, out_pad)
            idx += 2
            # MXU: bf16 operands, f32 accumulation.
            h = jnp.dot(x, w, preferred_element_type=jnp.float32) + b
            if use_ln:
                # One-pass biased statistics over the REAL hidden width.
                # Padded columns of h are exactly zero (zero weight cols/bias),
                # so full-width sums equal real-width sums. (One-pass form is
                # required here: two-pass would pick up (-mu)^2 from pad lanes.)
                s = jnp.sum(h, axis=-1, keepdims=True)
                ss = jnp.sum(h * h, axis=-1, keepdims=True)
                mu = s * inv_h
                var = jnp.maximum(ss * inv_h - mu * mu, 0.0)
                h = (h - mu) * jax.lax.rsqrt(var + eps)
                # Padded columns become -mu*rsqrt(...), but the next layer's
                # padded weight ROWS are zero, so they contribute nothing.
            h = jnp.maximum(h, 0.0)                        # ReLU (f32)
            x = h.astype(jnp.bfloat16)                     # single downcast per layer
        w = refs[idx][...]
        b = refs[idx + 1][...]
        y = jnp.dot(x, w, preferred_element_type=jnp.float32) + b
        o_ref[...] = y.astype(o_ref.dtype)                 # lane-dense bf16 (TB, 128) store

    return kernel


def prepare_params(params):
    """One-time (eager) parameter preparation.

    params: sequence of (W, b) in PyTorch nn.Linear layout W:(out,in), b:(out,).
    Returns a flat tuple (w1, b1, ..., w_out, b_out) with
      w_i : bf16 (in_pad, out_pad)   -- transposed; out padded to 128 multiples;
                                        in padded only to match previous layer's
                                        out_pad (first layer's K stays as-is).
      b_i : f32  (1, out_pad)        -- zero-padded.
    """
    prepared = []
    prev_out_pad = None
    for w, b in params:
        w = jnp.asarray(w, jnp.float32)
        b = jnp.asarray(b, jnp.float32)
        out_f, in_f = w.shape
        in_pad = in_f if prev_out_pad is None else prev_out_pad
        assert in_pad >= in_f
        out_pad = _round_up(out_f, _LANE)
        wt = jnp.zeros((in_pad, out_pad), jnp.bfloat16)
        wt = wt.at[:in_f, :out_f].set(w.T.astype(jnp.bfloat16))
        bp = jnp.zeros((1, out_pad), jnp.float32).at[0, :out_f].set(b)
        prepared += [wt, bp]
        prev_out_pad = out_pad
    return tuple(prepared)


def _param_spec(shape, single_buffer):
    """VMEM-resident param spec; single-buffered when supported."""
    if single_buffer:
        try:
            return pl.BlockSpec(shape, lambda i: (0, 0), pipeline_mode=pl.Buffered(1))
        except TypeError:
            pass
    return pl.BlockSpec(shape, lambda i: (0, 0))


@functools.partial(
    jax.jit,
    static_argnames=("num_layers", "hidden_size", "output_size", "nonlinearity",
                     "eps", "single_buffer_params"),
)
def _forward_impl(x, prepared, *, num_layers, hidden_size, output_size,
                  nonlinearity, eps, single_buffer_params):
    B, F = x.shape
    assert len(prepared) == 2 * (num_layers + 1)
    out_pad_final = prepared[-1].shape[1]
    widths = [F] + [prepared[2 * i].shape[1] for i in range(len(prepared) // 2)]
    max_w = max(widths)
    x_itemsize = jnp.dtype(x.dtype).itemsize

    # --- Batch tiling: big tiles (amortize ~0.35us/step), >=2 steps for v7x TCs.
    tb_cap = 512
    while tb_cap > 64 and tb_cap * max_w * 4 > 12 * 1024 * 1024:
        tb_cap //= 2                        # keep f32 working set per tile modest
    b_sub = _round_up(B, _SUBLANE)
    n_steps = max(1, pl.cdiv(b_sub, tb_cap))
    if n_steps == 1 and b_sub >= 2 * _SUBLANE:
        n_steps = 2                         # let v7x's two TCs each take a step
    TB = _round_up(pl.cdiv(B, n_steps), _SUBLANE)
    B_pad = n_steps * TB
    grid = (n_steps,)

    # Only pad the (cheap) batch rows when needed; no lane padding of x.
    x_in = x if B_pad == B else jnp.pad(x, ((0, B_pad - B), (0, 0)))

    # --- Specs.
    in_specs = [pl.BlockSpec((TB, F), lambda i: (i, 0))]
    for p in prepared:
        in_specs.append(_param_spec(p.shape, single_buffer_params))
    out_specs = pl.BlockSpec((TB, out_pad_final), lambda i: (i, 0))
    out_shape = jax.ShapeDtypeStruct((B_pad, out_pad_final), jnp.bfloat16)

    # --- Static cost model for XLA scheduling around the custom call.
    param_bytes = sum(int(p.size) * jnp.dtype(p.dtype).itemsize for p in prepared)
    flops = 0
    for widx in range(0, len(prepared), 2):
        ki, no = prepared[widx].shape
        flops += 2 * B_pad * ki * no
    transcendentals = B_pad * num_layers if nonlinearity is not None else 0
    bytes_accessed = (B_pad * F * x_itemsize + param_bytes
                      + B_pad * out_pad_final * 2)

    # --- VMEM budget: resident params (1x or 2x), double-buffered I/O, f32 temps.
    param_buf = 1 if single_buffer_params else 2
    vmem_need = (param_buf * param_bytes
                 + 2 * TB * F * x_itemsize
                 + 2 * TB * out_pad_final * 2
                 + 6 * TB * max_w * 4)
    vmem_cap = _vmem_capacity_bytes()
    vmem_limit = min(int(0.85 * vmem_cap),
                     max(32 * 1024 * 1024, int(1.5 * vmem_need)))
    # TODO(synk): weight-streaming fallback (inner pltpu.emit_pipeline over K/N)
    # if param_bytes ever exceeds ~0.75 * vmem_cap.

    kernel = _make_mlp_kernel(num_layers, use_ln=(nonlinearity is not None),
                              hidden_real=hidden_size, eps=eps)

    y = pl.pallas_call(
        kernel,
        out_shape=out_shape,
        grid=grid,
        in_specs=in_specs,
        out_specs=out_specs,
        compiler_params=pltpu.CompilerParams(
            dimension_semantics=("parallel",),     # megacore split on v7x
            vmem_limit_bytes=vmem_limit),
        cost_estimate=pl.CostEstimate(flops=flops,
                                      transcendentals=transcendentals,
                                      bytes_accessed=bytes_accessed),
    )(x_in, *prepared)

    # Strip batch padding / lane padding; logits were accumulated in f32, rounded
    # once to the bf16 slab; return f32 regardless of input dtype.
    return y[:B, :output_size].astype(jnp.float32)


def deep_dense_dann_forward(x, prepared, *, num_layers, hidden_size, output_size,
                            nonlinearity=None, eps=1e-5):
    """x: (B, input_size) float. prepared: output of prepare_params (weights pre-
    transposed/padded OUTSIDE the per-call path)."""
    kwargs = dict(num_layers=num_layers, hidden_size=hidden_size,
                  output_size=output_size, nonlinearity=nonlinearity, eps=eps)
    try:
        return _forward_impl(x, prepared, single_buffer_params=True, **kwargs)
    except Exception:
        # Fallback if this Pallas build rejects Buffered(1) single-buffering.
        return _forward_impl(x, prepared, single_buffer_params=False, **kwargs)


def _init_linear(key, fan_in, fan_out):
    """Deterministic PyTorch-nn.Linear-style uniform init, PyTorch layout."""
    kw, kb = jax.random.split(key)
    bound = 1.0 / float(fan_in) ** 0.5
    w = jax.random.uniform(kw, (fan_out, fan_in), jnp.float32, -bound, bound)
    b = jax.random.uniform(kb, (fan_out,), jnp.float32, -bound, bound)
    return w, b


def _reference_forward(x, params, num_layers, nonlinearity, eps=1e-5):
    """Plain-JAX f32 reference mirroring the PyTorch forward exactly."""
    h = x.astype(jnp.float32)
    for i in range(num_layers):
        w, b = params[i]
        h = h @ w.T + b
        if nonlinearity is not None:
            mu = jnp.mean(h, axis=-1, keepdims=True)
            var = jnp.mean((h - mu) ** 2, axis=-1, keepdims=True)
            h = (h - mu) * jax.lax.rsqrt(var + eps)
        h = jnp.maximum(h, 0.0)
    w, b = params[-1]
    return h @ w.T + b


if __name__ == "__main__":
    # Small shapes consistent with the module: dense MLP on (batch, input_size).
    input_size = 32
    hidden_size = 32
    output_size = 10
    num_layers = 2

    key = jax.random.PRNGKey(0)
    k_x, k1, k2, k_out = jax.random.split(key, 4)

    params = (
        _init_linear(k1, input_size, hidden_size),       # fc1
        _init_linear(k2, hidden_size, hidden_size),      # fc2
        _init_linear(k_out, hidden_size, output_size),   # fc_output
    )
    prepared = prepare_params(params)                    # one-time, outside jit

    # (batch, nonlinearity) cases: default path, LayerNorm path, and a batch
    # that exercises a multi-step grid + batch padding.
    cases = [(8, None), (8, "layernorm"), (40, "layernorm")]
    for batch, nonlinearity in cases:
        x = jax.random.normal(k_x, (batch, input_size), jnp.float32)
        out = deep_dense_dann_forward(
            x, prepared,
            num_layers=num_layers,
            hidden_size=hidden_size,
            output_size=output_size,
            nonlinearity=nonlinearity,
        )
        out = jax.block_until_ready(out)

        ref = _reference_forward(x, params, num_layers, nonlinearity)
        assert out.shape == (batch, output_size), out.shape
        # bf16 MXU operands + bf16 output slab -> compare within bf16 tolerance.
        assert jnp.allclose(out, ref, atol=5e-2, rtol=5e-2), \
            f"mismatch vs reference (batch={batch}, nonlinearity={nonlinearity})"

    print("KERNEL_OK")
</pallas_src>

<mosaic_0001>
module attributes {stable_mosaic.version = 11 : i64} {
  func.func @kernel(%arg0: i32, %arg1: memref<16x32xf32, #tpu.memory_space<vmem>>, %arg2: memref<32x128xbf16, #tpu.memory_space<vmem>>, %arg3: memref<1x128xf32, #tpu.memory_space<vmem>>, %arg4: memref<128x128xbf16, #tpu.memory_space<vmem>>, %arg5: memref<1x128xf32, #tpu.memory_space<vmem>>, %arg6: memref<128x128xbf16, #tpu.memory_space<vmem>>, %arg7: memref<1x128xf32, #tpu.memory_space<vmem>>, %arg8: memref<16x128xbf16, #tpu.memory_space<vmem>>) attributes {dimension_semantics = [#tpu.dimension_semantics<parallel>], iteration_bounds = array<i64: 1>, scalar_prefetch = 0 : i64, scratch_operands = 0 : i64, tpu.core_type = #tpu.core_type<tc>, window_params = [{transform_indices = @transform_0, window_bounds = array<i64: 16, 32>}, {pipeline_mode = #tpu.pipeline_mode<synchronous>, transform_indices = @transform_1, window_bounds = array<i64: 32, 128>}, {pipeline_mode = #tpu.pipeline_mode<synchronous>, transform_indices = @transform_2, window_bounds = array<i64: 1, 128>}, {pipeline_mode = #tpu.pipeline_mode<synchronous>, transform_indices = @transform_3, window_bounds = array<i64: 128, 128>}, {pipeline_mode = #tpu.pipeline_mode<synchronous>, transform_indices = @transform_4, window_bounds = array<i64: 1, 128>}, {pipeline_mode = #tpu.pipeline_mode<synchronous>, transform_indices = @transform_5, window_bounds = array<i64: 128, 128>}, {pipeline_mode = #tpu.pipeline_mode<synchronous>, transform_indices = @transform_6, window_bounds = array<i64: 1, 128>}, {transform_indices = @transform_7, window_bounds = array<i64: 16, 128>}]} {
    %c0 = arith.constant 0 : index
    %c0_0 = arith.constant 0 : index
    %0 = vector.load %arg1[%c0, %c0_0] : memref<16x32xf32, #tpu.memory_space<vmem>>, vector<16x32xf32>
    %1 = arith.truncf %0 : vector<16x32xf32> to vector<16x32xbf16>
    %c0_1 = arith.constant 0 : index
    %c0_2 = arith.constant 0 : index
    %2 = vector.load %arg2[%c0_1, %c0_2] : memref<32x128xbf16, #tpu.memory_space<vmem>>, vector<32x128xbf16>
    %c0_3 = arith.constant 0 : index
    %c0_4 = arith.constant 0 : index
    %3 = vector.load %arg3[%c0_3, %c0_4] : memref<1x128xf32, #tpu.memory_space<vmem>>, vector<1x128xf32>
    %cst = arith.constant dense<0.000000e+00> : vector<16x128xf32>
    %4 = tpu.matmul %1, %2, %cst {dimension_numbers = #tpu.dot_dimension_numbers<[1], [0], [0], [1], [0, 0, 1, 1], [], []>} : vector<16x32xbf16>, vector<32x128xbf16>, vector<16x128xf32> -> vector<16x128xf32>
    %5 = vector.broadcast %3 : vector<1x128xf32> to vector<16x128xf32>
    %6 = arith.addf %4, %5 : vector<16x128xf32>
    %cst_5 = arith.constant 0.000000e+00 : f32
    %7 = vector.broadcast %cst_5 : f32 to vector<16x128xf32>
    %8 = arith.maximumf %6, %7 : vector<16x128xf32>
    %9 = arith.truncf %8 : vector<16x128xf32> to vector<16x128xbf16>
    %c0_6 = arith.constant 0 : index
    %c0_7 = arith.constant 0 : index
    %10 = vector.load %arg4[%c0_6, %c0_7] : memref<128x128xbf16, #tpu.memory_space<vmem>>, vector<128x128xbf16>
    %c0_8 = arith.constant 0 : index
    %c0_9 = arith.constant 0 : index
    %11 = vector.load %arg5[%c0_8, %c0_9] : memref<1x128xf32, #tpu.memory_space<vmem>>, vector<1x128xf32>
    %cst_10 = arith.constant dense<0.000000e+00> : vector<16x128xf32>
    %12 = tpu.matmul %9, %10, %cst_10 {dimension_numbers = #tpu.dot_dimension_numbers<[1], [0], [0], [1], [0, 0, 1, 1], [], []>} : vector<16x128xbf16>, vector<128x128xbf16>, vector<16x128xf32> -> vector<16x128xf32>
    %13 = vector.broadcast %11 : vector<1x128xf32> to vector<16x128xf32>
    %14 = arith.addf %12, %13 : vector<16x128xf32>
    %cst_11 = arith.constant 0.000000e+00 : f32
    %15 = vector.broadcast %cst_11 : f32 to vector<16x128xf32>
    %16 = arith.maximumf %14, %15 : vector<16x128xf32>
    %17 = arith.truncf %16 : vector<16x128xf32> to vector<16x128xbf16>
    %c0_12 = arith.constant 0 : index
    %c0_13 = arith.constant 0 : index
    %18 = vector.load %arg6[%c0_12, %c0_13] : memref<128x128xbf16, #tpu.memory_space<vmem>>, vector<128x128xbf16>
    %c0_14 = arith.constant 0 : index
    %c0_15 = arith.constant 0 : index
    %19 = vector.load %arg7[%c0_14, %c0_15] : memref<1x128xf32, #tpu.memory_space<vmem>>, vector<1x128xf32>
    %cst_16 = arith.constant dense<0.000000e+00> : vector<16x128xf32>
    %20 = tpu.matmul %17, %18, %cst_16 {dimension_numbers = #tpu.dot_dimension_numbers<[1], [0], [0], [1], [0, 0, 1, 1], [], []>} : vector<16x128xbf16>, vector<128x128xbf16>, vector<16x128xf32> -> vector<16x128xf32>
    %21 = vector.broadcast %19 : vector<1x128xf32> to vector<16x128xf32>
    %22 = arith.addf %20, %21 : vector<16x128xf32>
    %23 = arith.truncf %22 : vector<16x128xf32> to vector<16x128xbf16>
    %c0_17 = arith.constant 0 : index
    %c0_18 = arith.constant 0 : index
    %24 = vector.load %arg8[%c0_17, %c0_18] : memref<16x128xbf16, #tpu.memory_space<vmem>>, vector<16x128xbf16>
    tpu.vector_store %arg8[%c0_17, %c0_18], %23 {strides = array<i32>} : memref<16x128xbf16, #tpu.memory_space<vmem>>, vector<16x128xbf16>,
    return
  }
  func.func @transform_0(%arg0: i32) -> (i32, i32) {
    %c0_i32 = arith.constant 0 : i32
    %c0_i32_0 = arith.constant 0 : i32
    return %arg0, %c0_i32 : i32, i32
  }
  func.func @transform_1(%arg0: i32) -> (i32, i32) {
    %c0_i32 = arith.constant 0 : i32
    %c0_i32_0 = arith.constant 0 : i32
    %c0_i32_1 = arith.constant 0 : i32
    return %c0_i32, %c0_i32_0 : i32, i32
  }
  func.func @transform_2(%arg0: i32) -> (i32, i32) {
    %c0_i32 = arith.constant 0 : i32
    %c0_i32_0 = arith.constant 0 : i32
    %c0_i32_1 = arith.constant 0 : i32
    return %c0_i32, %c0_i32_0 : i32, i32
  }
  func.func @transform_3(%arg0: i32) -> (i32, i32) {
    %c0_i32 = arith.constant 0 : i32
    %c0_i32_0 = arith.constant 0 : i32
    %c0_i32_1 = arith.constant 0 : i32
    return %c0_i32, %c0_i32_0 : i32, i32
  }
  func.func @transform_4(%arg0: i32) -> (i32, i32) {
    %c0_i32 = arith.constant 0 : i32
    %c0_i32_0 = arith.constant 0 : i32
    %c0_i32_1 = arith.constant 0 : i32
    return %c0_i32, %c0_i32_0 : i32, i32
  }
  func.func @transform_5(%arg0: i32) -> (i32, i32) {
    %c0_i32 = arith.constant 0 : i32
    %c0_i32_0 = arith.constant 0 : i32
    %c0_i32_1 = arith.constant 0 : i32
    return %c0_i32, %c0_i32_0 : i32, i32
  }
  func.func @transform_6(%arg0: i32) -> (i32, i32) {
    %c0_i32 = arith.constant 0 : i32
    %c0_i32_0 = arith.constant 0 : i32
    %c0_i32_1 = arith.constant 0 : i32
    return %c0_i32, %c0_i32_0 : i32, i32
  }
  func.func @transform_7(%arg0: i32) -> (i32, i32) {
    %c0_i32 = arith.constant 0 : i32
    %c0_i32_0 = arith.constant 0 : i32
    return %arg0, %c0_i32 : i32, i32
  }
}

module attributes {stable_mosaic.version = 11 : i64} {
  func.func @kernel(%arg0: i32, %arg1: memref<16x32xf32, #tpu.memory_space<vmem>>, %arg2: memref<32x128xbf16, #tpu.memory_space<vmem>>, %arg3: memref<1x128xf32, #tpu.memory_space<vmem>>, %arg4: memref<128x128xbf16, #tpu.memory_space<vmem>>, %arg5: memref<1x128xf32, #tpu.memory_space<vmem>>, %arg6: memref<128x128xbf16, #tpu.memory_space<vmem>>, %arg7: memref<1x128xf32, #tpu.memory_space<vmem>>, %arg8: memref<16x128xbf16, #tpu.memory_space<vmem>>) attributes {dimension_semantics = [#tpu.dimension_semantics<parallel>], iteration_bounds = array<i64: 1>, scalar_prefetch = 0 : i64, scratch_operands = 0 : i64, tpu.core_type = #tpu.core_type<tc>, window_params = [{transform_indices = @transform_0, window_bounds = array<i64: 16, 32>}, {pipeline_mode = #tpu.pipeline_mode<synchronous>, transform_indices = @transform_1, window_bounds = array<i64: 32, 128>}, {pipeline_mode = #tpu.pipeline_mode<synchronous>, transform_indices = @transform_2, window_bounds = array<i64: 1, 128>}, {pipeline_mode = #tpu.pipeline_mode<synchronous>, transform_indices = @transform_3, window_bounds = array<i64: 128, 128>}, {pipeline_mode = #tpu.pipeline_mode<synchronous>, transform_indices = @transform_4, window_bounds = array<i64: 1, 128>}, {pipeline_mode = #tpu.pipeline_mode<synchronous>, transform_indices = @transform_5, window_bounds = array<i64: 128, 128>}, {pipeline_mode = #tpu.pipeline_mode<synchronous>, transform_indices = @transform_6, window_bounds = array<i64: 1, 128>}, {transform_indices = @transform_7, window_bounds = array<i64: 16, 128>}]} {
    %c0 = arith.constant 0 : index
    %c0_0 = arith.constant 0 : index
    %0 = vector.load %arg1[%c0, %c0_0] : memref<16x32xf32, #tpu.memory_space<vmem>>, vector<16x32xf32>
    %1 = arith.truncf %0 : vector<16x32xf32> to vector<16x32xbf16>
    %c0_1 = arith.constant 0 : index
    %c0_2 = arith.constant 0 : index
    %2 = vector.load %arg2[%c0_1, %c0_2] : memref<32x128xbf16, #tpu.memory_space<vmem>>, vector<32x128xbf16>
    %c0_3 = arith.constant 0 : index
    %c0_4 = arith.constant 0 : index
    %3 = vector.load %arg3[%c0_3, %c0_4] : memref<1x128xf32, #tpu.memory_space<vmem>>, vector<1x128xf32>
    %cst = arith.constant dense<0.000000e+00> : vector<16x128xf32>
    %4 = tpu.matmul %1, %2, %cst {dimension_numbers = #tpu.dot_dimension_numbers<[1], [0], [0], [1], [0, 0, 1, 1], [], []>} : vector<16x32xbf16>, vector<32x128xbf16>, vector<16x128xf32> -> vector<16x128xf32>
    %5 = vector.broadcast %3 : vector<1x128xf32> to vector<16x128xf32>
    %6 = arith.addf %4, %5 : vector<16x128xf32>
    %cst_5 = arith.constant 0.000000e+00 : f32
    %7 = vector.broadcast %cst_5 : f32 to vector<16x128xf32>
    %8 = arith.maximumf %6, %7 : vector<16x128xf32>
    %9 = arith.truncf %8 : vector<16x128xf32> to vector<16x128xbf16>
    %c0_6 = arith.constant 0 : index
    %c0_7 = arith.constant 0 : index
    %10 = vector.load %arg4[%c0_6, %c0_7] : memref<128x128xbf16, #tpu.memory_space<vmem>>, vector<128x128xbf16>
    %c0_8 = arith.constant 0 : index
    %c0_9 = arith.constant 0 : index
    %11 = vector.load %arg5[%c0_8, %c0_9] : memref<1x128xf32, #tpu.memory_space<vmem>>, vector<1x128xf32>
    %cst_10 = arith.constant dense<0.000000e+00> : vector<16x128xf32>
    %12 = tpu.matmul %9, %10, %cst_10 {dimension_numbers = #tpu.dot_dimension_numbers<[1], [0], [0], [1], [0, 0, 1, 1], [], []>} : vector<16x128xbf16>, vector<128x128xbf16>, vector<16x128xf32> -> vector<16x128xf32>
    %13 = vector.broadcast %11 : vector<1x128xf32> to vector<16x128xf32>
    %14 = arith.addf %12, %13 : vector<16x128xf32>
    %cst_11 = arith.constant 0.000000e+00 : f32
    %15 = vector.broadcast %cst_11 : f32 to vector<16x128xf32>
    %16 = arith.maximumf %14, %15 : vector<16x128xf32>
    %17 = arith.truncf %16 : vector<16x128xf32> to vector<16x128xbf16>
    %c0_12 = arith.constant 0 : index
    %c0_13 = arith.constant 0 : index
    %18 = vector.load %arg6[%c0_12, %c0_13] : memref<128x128xbf16, #tpu.memory_space<vmem>>, vector<128x128xbf16>
    %c0_14 = arith.constant 0 : index
    %c0_15 = arith.constant 0 : index
    %19 = vector.load %arg7[%c0_14, %c0_15] : memref<1x128xf32, #tpu.memory_space<vmem>>, vector<1x128xf32>
    %cst_16 = arith.constant dense<0.000000e+00> : vector<16x128xf32>
    %20 = tpu.matmul %17, %18, %cst_16 {dimension_numbers = #tpu.dot_dimension_numbers<[1], [0], [0], [1], [0, 0, 1, 1], [], []>} : vector<16x128xbf16>, vector<128x128xbf16>, vector<16x128xf32> -> vector<16x128xf32>
    %21 = vector.broadcast %19 : vector<1x128xf32> to vector<16x128xf32>
    %22 = arith.addf %20, %21 : vector<16x128xf32>
    %23 = arith.truncf %22 : vector<16x128xf32> to vector<16x128xbf16>
    %c0_17 = arith.constant 0 : index
    %c0_18 = arith.constant 0 : index
    %24 = vector.load %arg8[%c0_17, %c0_18] : memref<16x128xbf16, #tpu.memory_space<vmem>>, vector<16x128xbf16>
    tpu.vector_store %arg8[%c0_17, %c0_18], %23 {strides = array<i32>} : memref<16x128xbf16, #tpu.memory_space<vmem>>, vector<16x128xbf16>,
    return
  }
  func.func @transform_0(%arg0: i32) -> (i32, i32) {
    %c0_i32 = arith.constant 0 : i32
    %c0_i32_0 = arith.constant 0 : i32
    return %arg0, %c0_i32 : i32, i32
  }
  func.func @transform_1(%arg0: i32) -> (i32, i32) {
    %c0_i32 = arith.constant 0 : i32
    %c0_i32_0 = arith.constant 0 : i32
    %c0_i32_1 = arith.constant 0 : i32
    return %c0_i32, %c0_i32_0 : i32, i32
  }
  func.func @transform_2(%arg0: i32) -> (i32, i32) {
    %c0_i32 = arith.constant 0 : i32
    %c0_i32_0 = arith.constant 0 : i32
    %c0_i32_1 = arith.constant 0 : i32
    return %c0_i32, %c0_i32_0 : i32, i32
  }
  func.func @transform_3(%arg0: i32) -> (i32, i32) {
    %c0_i32 = arith.constant 0 : i32
    %c0_i32_0 = arith.constant 0 : i32
    %c0_i32_1 = arith.constant 0 : i32
    return %c0_i32, %c0_i32_0 : i32, i32
  }
  func.func @transform_4(%arg0: i32) -> (i32, i32) {
    %c0_i32 = arith.constant 0 : i32
    %c0_i32_0 = arith.constant 0 : i32
    %c0_i32_1 = arith.constant 0 : i32
    return %c0_i32, %c0_i32_0 : i32, i32
  }
  func.func @transform_5(%arg0: i32) -> (i32, i32) {
    %c0_i32 = arith.constant 0 : i32
    %c0_i32_0 = arith.constant 0 : i32
    %c0_i32_1 = arith.constant 0 : i32
    return %c0_i32, %c0_i32_0 : i32, i32
  }
  func.func @transform_6(%arg0: i32) -> (i32, i32) {
    %c0_i32 = arith.constant 0 : i32
    %c0_i32_0 = arith.constant 0 : i32
    %c0_i32_1 = arith.constant 0 : i32
    return %c0_i32, %c0_i32_0 : i32, i32
  }
  func.func @transform_7(%arg0: i32) -> (i32, i32) {
    %c0_i32 = arith.constant 0 : i32
    %c0_i32_0 = arith.constant 0 : i32
    return %arg0, %c0_i32 : i32, i32
  }
}

</mosaic_0001>

<bundles_post_ra>
// kernel: _forward_impl.1
= control target key start
LH: loop header
LB: loop body
LE: loop exit
PB: predicated region body
PF: predicated region fallthrough
CT: control target
= control target key end

     0   :  { %12 = vsyncpa [#allocation3], 0  ;;  %s640_s0 = inlined_call_operand.vmem [shape: f32[16,32], index: 0, kind: input, shape index: {}]   ;;  %s641_s1 = inlined_call_operand.vmem [shape: bf16[32,128], index: 1, kind: input, shape index: {}]   ;;  %s642_s2 = inlined_call_operand.vmem [shape: f32[1,128], index: 2, kind: input, shape index: {}]   ;;  %s643_s3 = inlined_call_operand.hbm [shape: bf16[128,128], index: 3, kind: input, shape index: {}]   ;;  %s644_s4 = inlined_call_operand.vmem [shape: f32[1,128], index: 4, kind: input, shape index: {}]   ;;  %s645_s5 = inlined_call_operand.hbm [shape: bf16[128,128], index: 5, kind: input, shape index: {}]   ;;  %s646_s6 = inlined_call_operand.vmem [shape: f32[1,128], index: 6, kind: input, shape index: {}]   ;;  %s647_s7 = inlined_call_operand.vmem [shape: bf16[16,128], index: 7, kind: output, shape index: {}]  }
   0x1   :  { %13 = vsyncpa [#allocation5], 0  ;;  %s540_s24 = smov [#allocation2]  }
   0x2   :  { %s25_s25 = sshll.u32 %s540_s24, 4  ;;  %s26_s25 = int_to_ptr.vmem [resolvable:$true] %s25_s25 }
   0x3   :  { %s504_s26 = scalar_lea.vmem %s26_s25, 1024  ;;  %p509_p1 = scmp.lt.s32.totalorder %s26_s25, %s26_s25 }
   0x4   :  { %p505_p0 = scmp.ne.s32.totalorder %s26_s25, %s504_s26  ;;  %p510_p2 = scmp.lt.s32.totalorder %s504_s26, %s504_s26 }
   0x6   :  { %p511_p3 = por %p510_p2, %p509_p1 }
   0x8   :  { %p512_p4 = pnand %p511_p3, %p505_p0 }
   0xa   :  { %515 = shalt.err (!%p512_p4)
}
   0xb   :  { %s541_s27 = smov 64   ;;  %s542_s28 = smov 4  }
   0xc   :  { %31 = dma.hbm_to_vmem [thread:$0]  %s643_s3, 1024, %s26_s25, [#allocation3], %s541_s27, %s541_s27, %s542_s28  }
   0xd   :  { %s543_s8 = smov [#allocation4]  }
   0xe   :  { %s39_s9 = sshll.u32 %s543_s8, 4  ;;  %s40_s9 = int_to_ptr.vmem [resolvable:$true] %s39_s9 }
   0xf   :  { %s524_s10 = scalar_lea.vmem %s40_s9, 1024  ;;  %p529_p6 = scmp.lt.s32.totalorder %s40_s9, %s40_s9 }
  0x10   :  { %p525_p5 = scmp.ne.s32.totalorder %s40_s9, %s524_s10  ;;  %p530_p7 = scmp.lt.s32.totalorder %s524_s10, %s524_s10 }
  0x12   :  { %p531_p8 = por %p530_p7, %p529_p6 }
  0x14   :  { %p532_p9 = pnand %p531_p8, %p525_p5 }
  0x16   :  { %535 = shalt.err (!%p532_p9)
}
  0x17   :  { %45 = dma.hbm_to_vmem [thread:$0]  %s645_s5, 1024, %s40_s9, [#allocation5], %s541_s27, %s541_s27, %s542_s28  }
  0x18   :  { %536 = dma.done.wait [#allocation3], 1024  }
  0x19   :  { %537 = vsyncadd [#allocation3], 4294966272 }
  0x1a   :  { %538 = dma.done.wait [#allocation5], 1024  }
  0x1b   :  { %539 = vsyncadd [#allocation5], 4294966272  ;;  %v544_v0 = vmov 0.0   ;;  %vm545_vm0 = vmmov 0   ;;  %v478_v1 = vld [vmem:[%s641_s1 + $0x8] sm:$0xff]   ;;  %v479_v2 = vld [vmem:[%s641_s1] sm:$0xff]  }
  0x1c   :  { %424 = vmatprep.subr.bf16.mxu0 %v544_v0  ;;  %428 = vmatprep.mubr.msk.bf16.mxu0 %vm545_vm0, %v544_v0  ;;  %v55_v3 = vld [vmem:[%s640_s0] sm:$0xff]  ;;  %v56_v4 = vld [vmem:[%s640_s0 + $0x8] sm:$0xff]  ;;  %v480_v5 = vld [vmem:[#allocation2 + $0x38] sm:$0xff]   ;;  %vm81_vm1 = vcmask 261120  }
  0x1d   :  { %432 = vmatprep.subr.bf16.mxu1 %v544_v0  ;;  %448 = vmatprep.mubr.msk.bf16.mxu1 %vm545_vm0, %v544_v0  ;;  %v57_v6 = vpack.c.bf16 %v56_v4, %v55_v3  ;;  %v481_v7 = vld [vmem:[#allocation2 + $0x30] sm:$0xff]   ;;  %v482_v8 = vld [vmem:[#allocation2 + $0x28] sm:$0xff]   ;;  %v483_v9 = vld [vmem:[#allocation2 + $0x20] sm:$0xff]  }
  0x1e   :  { %425 = vmatpush3.bf16.msra.mxu0 %v478_v1  ;;  %433 = vmatpush3.bf16.msra.mxu1 %v480_v5  ;;  %v484_v10 = vld [vmem:[#allocation2 + $0x18] sm:$0xff]   ;;  %v485_v11 = vld [vmem:[#allocation2 + $0x10] sm:$0xff]   ;;  %v486_v12 = vld [vmem:[#allocation2 + $0x8] sm:$0xff]  }
  0x1f   :  { %426 = vmatprep.subr.bf16.mxu0 %v544_v0  ;;  %434 = vmatprep.subr.bf16.mxu1 %v544_v0  ;;  %v487_v13 = vld [vmem:[#allocation2] sm:$0xff]   ;;  %v488_v14 = vld [vmem:[#allocation4 + $0x38] sm:$0xff]   ;;  %v489_v15 = vld [vmem:[#allocation4 + $0x30] sm:$0xff]  }
  0x20   :  { %v490_v16 = vld [vmem:[#allocation4 + $0x28] sm:$0xff]   ;;  %v491_v17 = vld [vmem:[#allocation4 + $0x20] sm:$0xff]   ;;  %v492_v18 = vld [vmem:[#allocation4 + $0x18] sm:$0xff]  }
  0x21   :  { %v372_v19 = vld [vmem:[%s642_s2] ss:$0 sm:$0xff]  ;;  %v493_v29 = vld [vmem:[#allocation4 + $0x10] sm:$0xff]   ;;  %v494_v30 = vld [vmem:[#allocation4 + $0x8] sm:$0xff]  }
  0x22   :  { %427 = vmatpush3.bf16.msra.mxu0 %v479_v2  ;;  %435 = vmatpush3.bf16.msra.mxu1 %v481_v7  ;;  %v495_v31 = vld [vmem:[#allocation4] sm:$0xff]  }
  0x23   :  { %452 = vmatprep.subr.bf16.mxu0 %v544_v0  ;;  %436 = vmatprep.subr.bf16.mxu1 %v544_v0  ;;  %v376_v32 = vld [vmem:[%s644_s4] ss:$0 sm:$0xff] }
  0x24   :  { %v385_v43 = vld [vmem:[%s646_s6] ss:$0 sm:$0xff] }
  0x25   :  { %429 = vmatmul.mubr.msk.bf16.vlgmr.msra.gmra.mxu0 %vm81_vm1, %v57_v6 }
  0x26   :  { %468 = vmatprep.mubr.msk.bf16.mxu0 %vm545_vm0, %v544_v0  ;;  %437 = vmatpush3.bf16.msra.mxu1 %v482_v8 }
  0x27   :  { %438 = vmatprep.subr.bf16.mxu1 %v544_v0  ;;  %453 = vmatpush3.bf16.msra.mxu0 %v488_v14 }
  0x28   :  { %454 = vmatprep.subr.bf16.mxu0 %v544_v0 }
  0x2a   :  { %439 = vmatpush3.bf16.msra.mxu1 %v483_v9 }
  0x2b   :  { %440 = vmatprep.subr.bf16.mxu1 %v544_v0  ;;  %455 = vmatpush3.bf16.msra.mxu0 %v489_v15 }
  0x2c   :  { %456 = vmatprep.subr.bf16.mxu0 %v544_v0 }
  0x2e   :  { %441 = vmatpush3.bf16.msra.mxu1 %v484_v10 }
  0x2f   :  { %442 = vmatprep.subr.bf16.mxu1 %v544_v0  ;;  %457 = vmatpush3.bf16.msra.mxu0 %v490_v16 }
  0x30   :  { %458 = vmatprep.subr.bf16.mxu0 %v544_v0 }
  0x32   :  { %443 = vmatpush3.bf16.msra.mxu1 %v485_v11 }
  0x33   :  { %444 = vmatprep.subr.bf16.mxu1 %v544_v0  ;;  %459 = vmatpush3.bf16.msra.mxu0 %v491_v17 }
  0x34   :  { %460 = vmatprep.subr.bf16.mxu0 %v544_v0 }
  0x36   :  { %445 = vmatpush3.bf16.msra.mxu1 %v486_v12 }
  0x37   :  { %446 = vmatprep.subr.bf16.mxu1 %v544_v0  ;;  %461 = vmatpush3.bf16.msra.mxu0 %v492_v18 }
  0x38   :  { %462 = vmatprep.subr.bf16.mxu0 %v544_v0 }
  0x3a   :  { %447 = vmatpush3.bf16.msra.mxu1 %v487_v13 }
  0x3b   :  { %463 = vmatpush3.bf16.msra.mxu0 %v493_v29 }
  0x3c   :  { %464 = vmatprep.subr.bf16.mxu0 %v544_v0 }
  0x3f   :  { %465 = vmatpush3.bf16.msra.mxu0 %v494_v30 }
  0x40   :  { %466 = vmatprep.subr.bf16.mxu0 %v544_v0 }
  0x43   :  { %467 = vmatpush3.bf16.msra.mxu0 %v495_v31 }
  0xe5   :  { %v119_v20 = vpop.f32.mrf.mxu0 }
  0xe6   :  { %v120_v22 = vadd.f32 %v372_v19, %v119_v20 }
  0xe7   :  { %v430_v21 = vpop.f32.mrf.mxu0 }
  0xe8   :  { %v126_v26 = vmax.f32 %v120_v22, 0.0 }
  0xe9   :  { %v122_v23 = vpop.f32.mrf.mxu0 }
  0xea   :  { %v123_v24 = vadd.f32 %v372_v19, %v122_v23 }
  0xeb   :  { %v431_v25 = vpop.f32.mrf.mxu0 }
  0xec   :  { %v127_v27 = vmax.f32 %v123_v24, 0.0 }
  0xee   :  { %v128_v28 = vpack.c.bf16 %v127_v27, %v126_v26 }
  0xf0   :  { %449 = vmatmul.mubr.bf16.vlgmr.msra.gmra.mxu1 %v128_v28 }
 0x1b0   :  { %v234_v33 = vpop.f32.mrf.mxu1 }
 0x1b1   :  { %v235_v35 = vadd.f32 %v376_v32, %v234_v33 }
 0x1b2   :  { %v450_v34 = vpop.f32.mrf.mxu1 }
 0x1b3   :  { %v241_v39 = vmax.f32 %v235_v35, 0.0 }
 0x1b4   :  { %v237_v36 = vpop.f32.mrf.mxu1 }
 0x1b5   :  { %v238_v37 = vadd.f32 %v376_v32, %v237_v36 }
 0x1b6   :  { %v451_v38 = vpop.f32.mrf.mxu1 }
 0x1b7   :  { %v242_v40 = vmax.f32 %v238_v37, 0.0 }
 0x1b9   :  { %v243_v41 = vpack.c.bf16 %v242_v40, %v241_v39 }
 0x1bb   :  { %469 = vmatmul.mubr.bf16.vlgmr.msra.gmra.mxu0 %v243_v41 }
 0x27b   :  { %v349_v42 = vpop.f32.mrf.mxu0 }
 0x27c   :  { %v350_v46 = vadd.f32 %v385_v43, %v349_v42 }
 0x27d   :  { %v470_v44 = vpop.f32.mrf.mxu0 }
 0x27f   :  { %v352_v45 = vpop.f32.mrf.mxu0 }
 0x280   :  { %v353_v47 = vadd.f32 %v385_v43, %v352_v45 }
 0x281   :  { %v471_v48 = vpop.f32.mrf.mxu0 }
 0x282   :  { %v401_v49 = vpack.c.bf16 %v353_v47, %v350_v46 }
 0x284   :  { %402 = vst [vmem:[%s647_s7] sm:$0xff] %v401_v49  }
 0x285   :  { %370 = vsyncpa [#allocation3], 1 }
 0x286   :  { %371 = vsyncpa [#allocation5], 1 }

// kernel: _forward_impl.1
= control target key start
LH: loop header
LB: loop body
LE: loop exit
PB: predicated region body
PF: predicated region fallthrough
CT: control target
= control target key end

     0   :  { %12 = vsyncpa [#allocation3], 0  ;;  %s640_s0 = inlined_call_operand.vmem [shape: f32[16,32], index: 0, kind: input, shape index: {}]   ;;  %s641_s1 = inlined_call_operand.vmem [shape: bf16[32,128], index: 1, kind: input, shape index: {}]   ;;  %s642_s2 = inlined_call_operand.vmem [shape: f32[1,128], index: 2, kind: input, shape index: {}]   ;;  %s643_s3 = inlined_call_operand.hbm [shape: bf16[128,128], index: 3, kind: input, shape index: {}]   ;;  %s644_s4 = inlined_call_operand.vmem [shape: f32[1,128], index: 4, kind: input, shape index: {}]   ;;  %s645_s5 = inlined_call_operand.hbm [shape: bf16[128,128], index: 5, kind: input, shape index: {}]   ;;  %s646_s6 = inlined_call_operand.vmem [shape: f32[1,128], index: 6, kind: input, shape index: {}]   ;;  %s647_s7 = inlined_call_operand.vmem [shape: bf16[16,128], index: 7, kind: output, shape index: {}]  }
   0x1   :  { %13 = vsyncpa [#allocation5], 0  ;;  %s540_s24 = smov [#allocation2]  }
   0x2   :  { %s25_s25 = sshll.u32 %s540_s24, 4  ;;  %s26_s25 = int_to_ptr.vmem [resolvable:$true] %s25_s25 }
   0x3   :  { %s504_s26 = scalar_lea.vmem %s26_s25, 1024  ;;  %p509_p1 = scmp.lt.s32.totalorder %s26_s25, %s26_s25 }
   0x4   :  { %p505_p0 = scmp.ne.s32.totalorder %s26_s25, %s504_s26  ;;  %p510_p2 = scmp.lt.s32.totalorder %s504_s26, %s504_s26 }
   0x6   :  { %p511_p3 = por %p510_p2, %p509_p1 }
   0x8   :  { %p512_p4 = pnand %p511_p3, %p505_p0 }
   0xa   :  { %515 = shalt.err (!%p512_p4)
}
   0xb   :  { %s541_s27 = smov 64   ;;  %s542_s28 = smov 4  }
   0xc   :  { %31 = dma.hbm_to_vmem [thread:$0]  %s643_s3, 1024, %s26_s25, [#allocation3], %s541_s27, %s541_s27, %s542_s28  }
   0xd   :  { %s543_s8 = smov [#allocation4]  }
   0xe   :  { %s39_s9 = sshll.u32 %s543_s8, 4  ;;  %s40_s9 = int_to_ptr.vmem [resolvable:$true] %s39_s9 }
   0xf   :  { %s524_s10 = scalar_lea.vmem %s40_s9, 1024  ;;  %p529_p6 = scmp.lt.s32.totalorder %s40_s9, %s40_s9 }
  0x10   :  { %p525_p5 = scmp.ne.s32.totalorder %s40_s9, %s524_s10  ;;  %p530_p7 = scmp.lt.s32.totalorder %s524_s10, %s524_s10 }
  0x12   :  { %p531_p8 = por %p530_p7, %p529_p6 }
  0x14   :  { %p532_p9 = pnand %p531_p8, %p525_p5 }
  0x16   :  { %535 = shalt.err (!%p532_p9)
}
  0x17   :  { %45 = dma.hbm_to_vmem [thread:$0]  %s645_s5, 1024, %s40_s9, [#allocation5], %s541_s27, %s541_s27, %s542_s28  }
  0x18   :  { %536 = dma.done.wait [#allocation3], 1024  }
  0x19   :  { %537 = vsyncadd [#allocation3], 4294966272 }
  0x1a   :  { %538 = dma.done.wait [#allocation5], 1024  }
  0x1b   :  { %539 = vsyncadd [#allocation5], 4294966272  ;;  %v544_v0 = vmov 0.0   ;;  %vm545_vm0 = vmmov 0   ;;  %v478_v1 = vld [vmem:[%s641_s1 + $0x8] sm:$0xff]   ;;  %v479_v2 = vld [vmem:[%s641_s1] sm:$0xff]  }
  0x1c   :  { %424 = vmatprep.subr.bf16.mxu0 %v544_v0  ;;  %428 = vmatprep.mubr.msk.bf16.mxu0 %vm545_vm0, %v544_v0  ;;  %v55_v3 = vld [vmem:[%s640_s0] sm:$0xff]  ;;  %v56_v4 = vld [vmem:[%s640_s0 + $0x8] sm:$0xff]  ;;  %v480_v5 = vld [vmem:[#allocation2 + $0x38] sm:$0xff]   ;;  %vm81_vm1 = vcmask 261120  }
  0x1d   :  { %432 = vmatprep.subr.bf16.mxu1 %v544_v0  ;;  %448 = vmatprep.mubr.msk.bf16.mxu1 %vm545_vm0, %v544_v0  ;;  %v57_v6 = vpack.c.bf16 %v56_v4, %v55_v3  ;;  %v481_v7 = vld [vmem:[#allocation2 + $0x30] sm:$0xff]   ;;  %v482_v8 = vld [vmem:[#allocation2 + $0x28] sm:$0xff]   ;;  %v483_v9 = vld [vmem:[#allocation2 + $0x20] sm:$0xff]  }
  0x1e   :  { %425 = vmatpush3.bf16.msra.mxu0 %v478_v1  ;;  %433 = vmatpush3.bf16.msra.mxu1 %v480_v5  ;;  %v484_v10 = vld [vmem:[#allocation2 + $0x18] sm:$0xff]   ;;  %v485_v11 = vld [vmem:[#allocation2 + $0x10] sm:$0xff]   ;;  %v486_v12 = vld [vmem:[#allocation2 + $0x8] sm:$0xff]  }
  0x1f   :  { %426 = vmatprep.subr.bf16.mxu0 %v544_v0  ;;  %434 = vmatprep.subr.bf16.mxu1 %v544_v0  ;;  %v487_v13 = vld [vmem:[#allocation2] sm:$0xff]   ;;  %v488_v14 = vld [vmem:[#allocation4 + $0x38] sm:$0xff]   ;;  %v489_v15 = vld [vmem:[#allocation4 + $0x30] sm:$0xff]  }
  0x20   :  { %v490_v16 = vld [vmem:[#allocation4 + $0x28] sm:$0xff]   ;;  %v491_v17 = vld [vmem:[#allocation4 + $0x20] sm:$0xff]   ;;  %v492_v18 = vld [vmem:[#allocation4 + $0x18] sm:$0xff]  }
  0x21   :  { %v372_v19 = vld [vmem:[%s642_s2] ss:$0 sm:$0xff]  ;;  %v493_v29 = vld [vmem:[#allocation4 + $0x10] sm:$0xff]   ;;  %v494_v30 = vld [vmem:[#allocation4 + $0x8] sm:$0xff]  }
  0x22   :  { %427 = vmatpush3.bf16.msra.mxu0 %v479_v2  ;;  %435 = vmatpush3.bf16.msra.mxu1 %v481_v7  ;;  %v495_v31 = vld [vmem:[#allocation4] sm:$0xff]  }
  0x23   :  { %452 = vmatprep.subr.bf16.mxu0 %v544_v0  ;;  %436 = vmatprep.subr.bf16.mxu1 %v544_v0  ;;  %v376_v32 = vld [vmem:[%s644_s4] ss:$0 sm:$0xff] }
  0x24   :  { %v385_v43 = vld [vmem:[%s646_s6] ss:$0 sm:$0xff] }
  0x25   :  { %429 = vmatmul.mubr.msk.bf16.vlgmr.msra.gmra.mxu0 %vm81_vm1, %v57_v6 }
  0x26   :  { %468 = vmatprep.mubr.msk.bf16.mxu0 %vm545_vm0, %v544_v0  ;;  %437 = vmatpush3.bf16.msra.mxu1 %v482_v8 }
  0x27   :  { %438 = vmatprep.subr.bf16.mxu1 %v544_v0  ;;  %453 = vmatpush3.bf16.msra.mxu0 %v488_v14 }
  0x28   :  { %454 = vmatprep.subr.bf16.mxu0 %v544_v0 }
  0x2a   :  { %439 = vmatpush3.bf16.msra.mxu1 %v483_v9 }
  0x2b   :  { %440 = vmatprep.subr.bf16.mxu1 %v544_v0  ;;  %455 = vmatpush3.bf16.msra.mxu0 %v489_v15 }
  0x2c   :  { %456 = vmatprep.subr.bf16.mxu0 %v544_v0 }
  0x2e   :  { %441 = vmatpush3.bf16.msra.mxu1 %v484_v10 }
  0x2f   :  { %442 = vmatprep.subr.bf16.mxu1 %v544_v0  ;;  %457 = vmatpush3.bf16.msra.mxu0 %v490_v16 }
  0x30   :  { %458 = vmatprep.subr.bf16.mxu0 %v544_v0 }
  0x32   :  { %443 = vmatpush3.bf16.msra.mxu1 %v485_v11 }
  0x33   :  { %444 = vmatprep.subr.bf16.mxu1 %v544_v0  ;;  %459 = vmatpush3.bf16.msra.mxu0 %v491_v17 }
  0x34   :  { %460 = vmatprep.subr.bf16.mxu0 %v544_v0 }
  0x36   :  { %445 = vmatpush3.bf16.msra.mxu1 %v486_v12 }
  0x37   :  { %446 = vmatprep.subr.bf16.mxu1 %v544_v0  ;;  %461 = vmatpush3.bf16.msra.mxu0 %v492_v18 }
  0x38   :  { %462 = vmatprep.subr.bf16.mxu0 %v544_v0 }
  0x3a   :  { %447 = vmatpush3.bf16.msra.mxu1 %v487_v13 }
  0x3b   :  { %463 = vmatpush3.bf16.msra.mxu0 %v493_v29 }
  0x3c   :  { %464 = vmatprep.subr.bf16.mxu0 %v544_v0 }
  0x3f   :  { %465 = vmatpush3.bf16.msra.mxu0 %v494_v30 }
  0x40   :  { %466 = vmatprep.subr.bf16.mxu0 %v544_v0 }
  0x43   :  { %467 = vmatpush3.bf16.msra.mxu0 %v495_v31 }
  0xe5   :  { %v119_v20 = vpop.f32.mrf.mxu0 }
  0xe6   :  { %v120_v22 = vadd.f32 %v372_v19, %v119_v20 }
  0xe7   :  { %v430_v21 = vpop.f32.mrf.mxu0 }
  0xe8   :  { %v126_v26 = vmax.f32 %v120_v22, 0.0 }
  0xe9   :  { %v122_v23 = vpop.f32.mrf.mxu0 }
  0xea   :  { %v123_v24 = vadd.f32 %v372_v19, %v122_v23 }
  0xeb   :  { %v431_v25 = vpop.f32.mrf.mxu0 }
  0xec   :  { %v127_v27 = vmax.f32 %v123_v24, 0.0 }
  0xee   :  { %v128_v28 = vpack.c.bf16 %v127_v27, %v126_v26 }
  0xf0   :  { %449 = vmatmul.mubr.bf16.vlgmr.msra.gmra.mxu1 %v128_v28 }
 0x1b0   :  { %v234_v33 = vpop.f32.mrf.mxu1 }
 0x1b1   :  { %v235_v35 = vadd.f32 %v376_v32, %v234_v33 }
 0x1b2   :  { %v450_v34 = vpop.f32.mrf.mxu1 }
 0x1b3   :  { %v241_v39 = vmax.f32 %v235_v35, 0.0 }
 0x1b4   :  { %v237_v36 = vpop.f32.mrf.mxu1 }
 0x1b5   :  { %v238_v37 = vadd.f32 %v376_v32, %v237_v36 }
 0x1b6   :  { %v451_v38 = vpop.f32.mrf.mxu1 }
 0x1b7   :  { %v242_v40 = vmax.f32 %v238_v37, 0.0 }
 0x1b9   :  { %v243_v41 = vpack.c.bf16 %v242_v40, %v241_v39 }
 0x1bb   :  { %469 = vmatmul.mubr.bf16.vlgmr.msra.gmra.mxu0 %v243_v41 }
 0x27b   :  { %v349_v42 = vpop.f32.mrf.mxu0 }
 0x27c   :  { %v350_v46 = vadd.f32 %v385_v43, %v349_v42 }
 0x27d   :  { %v470_v44 = vpop.f32.mrf.mxu0 }
 0x27f   :  { %v352_v45 = vpop.f32.mrf.mxu0 }
 0x280   :  { %v353_v47 = vadd.f32 %v385_v43, %v352_v45 }
 0x281   :  { %v471_v48 = vpop.f32.mrf.mxu0 }
 0x282   :  { %v401_v49 = vpack.c.bf16 %v353_v47, %v350_v46 }
 0x284   :  { %402 = vst [vmem:[%s647_s7] sm:$0xff] %v401_v49  }
 0x285   :  { %370 = vsyncpa [#allocation3], 1 }
 0x286   :  { %371 = vsyncpa [#allocation5], 1 }

</bundles_post_ra>
